<compile_context>
chip_gen: v7x
topology: tpu7x:2x2x1
jax: 0.10.0
libtpu: 0.0.40
codegen_flags: <defaults>
</compile_context>

<pallas_src>
import functools

import jax
import jax.numpy as jnp
from jax.experimental import pallas as pl
from jax.experimental.pallas import tpu as pltpu

EPS = 1e-5  # nn.LayerNorm default


def _round_up(x, m):
    return ((x + m - 1) // m) * m


def _norm_exchange_kernel(x1_ref, x2_ref, p_ref, o1_ref, o2_ref, *, inv_h):
    # Packed, pre-folded params (f32): rows are [s_x1, t_x1, s_x2, t_x2].
    p = p_ref[...]                                 # (4, H) f32
    s_x1, t_x1 = p[0:1, :], p[1:2, :]
    s_x2, t_x2 = p[2:3, :], p[3:4, :]

    def fused_ln_exchange(x_ref, s, t, o_ref):
        x = x_ref[...].astype(jnp.float32)         # f32 stats regardless of I/O dtype
        # One-pass statistics: two independent lane (XLU) reductions.
        sum_x = jnp.sum(x, axis=-1, keepdims=True)
        sum_x2 = jnp.sum(x * x, axis=-1, keepdims=True)
        mu = sum_x * inv_h
        var = jnp.maximum(sum_x2 * inv_h - mu * mu, 0.0)   # cancellation guard
        xn = (x - mu) * jax.lax.rsqrt(var + EPS)
        o_ref[...] = (x + s * xn + t).astype(o_ref.dtype)

    fused_ln_exchange(x1_ref, s_x1, t_x1, o1_ref)
    fused_ln_exchange(x2_ref, s_x2, t_x2, o2_ref)


def norm_exchange(x1, x2, norm_w, norm_b, gemma1, beta1, gemma2, beta2,
                  *, row_tile=None, vmem_limit_bytes=None, min_grid_steps=8):
    """x1, x2: (B, S, H); norm_w/norm_b/gemma*/beta*: (H,)."""
    B, S, H = x1.shape
    rows = B * S
    itemsize = jnp.dtype(x1.dtype).itemsize

    # dtype-aware sublane packing: 8 sublanes for f32, 16 for bf16, 32 for i8/fp8.
    sub = max(8, 32 // itemsize)

    # Row tile: target ~2 MiB per stream per buffer (mem-bound kernel),
    # rounded to the sublane packing, capped at 1024 rows.
    if row_tile is None:
        target_block_bytes = 2 * 1024 * 1024
        row_tile = target_block_bytes // max(1, H * itemsize)
    row_tile = max(sub, min(1024, (row_tile // sub) * sub))
    # Keep the grid long enough (>= ~8 steps) so both v7x TensorCores get work
    # and each core has prefetch/compute overlap.
    cap = max(sub, ((rows // min_grid_steps) // sub) * sub)
    row_tile = min(row_tile, cap)
    row_tile = min(row_tile, _round_up(rows, sub))

    grid = pl.cdiv(rows, row_tile)  # ragged last block: reads clipped per-row, writes masked

    # VMEM scoped limit from the actual working set (safe on v7x's 64 MiB VMEM):
    # 4 streams x 2 buffers x block + 2 x params + ~4 f32 temp blocks + margin.
    if vmem_limit_bytes is None:
        block_bytes = row_tile * H * itemsize
        f32_block = row_tile * H * 4
        param_bytes = 4 * H * 4
        working_set = 4 * 2 * block_bytes + 2 * param_bytes + 4 * f32_block
        vmem_limit_bytes = min(max(working_set + (4 << 20), 16 << 20), 40 << 20)

    # Pure reshapes (no copies): rows -> sublanes, hidden -> lanes.
    x1f = x1.reshape(rows, H)
    x2f = x2.reshape(rows, H)

    # Fold the affine params in f32:  x + g*(xn*w + b) + beta
    #                              == x + (g*w)*xn + (g*b + beta)
    w = norm_w.astype(jnp.float32)
    b = norm_b.astype(jnp.float32)
    g1 = gemma1.astype(jnp.float32)
    g2 = gemma2.astype(jnp.float32)
    be1 = beta1.astype(jnp.float32)
    be2 = beta2.astype(jnp.float32)
    params = jnp.stack([g2 * w, g2 * b + be2,    # applied to x1
                        g1 * w, g1 * b + be1],   # applied to x2
                       axis=0)                   # (4, H) f32

    kernel = functools.partial(_norm_exchange_kernel, inv_h=1.0 / H)

    # Full-H block dim (equal to the array extent) avoids any lane padding;
    # only the trailing partial vreg's store is masked when H % 128 != 0.
    row_spec = pl.BlockSpec((row_tile, H), lambda i: (i, 0))
    par_spec = pl.BlockSpec((4, H), lambda i: (0, 0))

    o1f, o2f = pl.pallas_call(
        kernel,
        out_shape=(jax.ShapeDtypeStruct((rows, H), x1.dtype),
                   jax.ShapeDtypeStruct((rows, H), x2.dtype)),
        grid_spec=pltpu.PrefetchScalarGridSpec(
            num_scalar_prefetch=0,
            grid=(grid,),
            in_specs=[row_spec, row_spec, par_spec],
            out_specs=[row_spec, row_spec],
        ),
        compiler_params=pltpu.CompilerParams(
            dimension_semantics=("parallel",),
            vmem_limit_bytes=vmem_limit_bytes),
    )(x1f, x2f, params)

    return o1f.reshape(B, S, H), o2f.reshape(B, S, H)


def _reference(x1, x2, norm_w, norm_b, gemma1, beta1, gemma2, beta2):
    def ln(x):
        x = x.astype(jnp.float32)
        mu = jnp.mean(x, axis=-1, keepdims=True)
        var = jnp.mean((x - mu) ** 2, axis=-1, keepdims=True)
        return (x - mu) / jnp.sqrt(var + EPS) * norm_w + norm_b
    r1 = x1 + gemma2 * ln(x1) + beta2
    r2 = x2 + gemma1 * ln(x2) + beta1
    return r1.astype(x1.dtype), r2.astype(x2.dtype)


if __name__ == "__main__":
    key = jax.random.PRNGKey(0)
    B, S, H = 2, 8, 32
    k1, k2, k3, k4, k5, k6 = jax.random.split(key, 6)

    x1 = jax.random.normal(k1, (B, S, H), dtype=jnp.float32)
    x2 = jax.random.normal(k2, (B, S, H), dtype=jnp.float32)

    # LayerNorm parameters (PyTorch default init: weight=1, bias=0)
    norm_w = jnp.ones((H,), dtype=jnp.float32)
    norm_b = jnp.zeros((H,), dtype=jnp.float32)

    # Exchange scale/shift parameters
    gemma1 = jax.random.normal(k3, (H,), dtype=jnp.float32)
    beta1 = jax.random.normal(k4, (H,), dtype=jnp.float32)
    gemma2 = jax.random.normal(k5, (H,), dtype=jnp.float32)
    beta2 = jax.random.normal(k6, (H,), dtype=jnp.float32)

    o1, o2 = norm_exchange(x1, x2, norm_w, norm_b,
                           gemma1, beta1, gemma2, beta2)
    jax.block_until_ready((o1, o2))

    r1, r2 = _reference(x1, x2, norm_w, norm_b,
                        gemma1, beta1, gemma2, beta2)
    assert jnp.allclose(o1, r1, atol=2e-5, rtol=2e-5), \
        float(jnp.max(jnp.abs(o1 - r1)))
    assert jnp.allclose(o2, r2, atol=2e-5, rtol=2e-5), \
        float(jnp.max(jnp.abs(o2 - r2)))

    print("KERNEL_OK")
</pallas_src>

<mosaic_0001>
module attributes {stable_mosaic.version = 11 : i64} {
  func.func @_norm_exchange_kernel(%arg0: i32, %arg1: memref<8x32xf32, #tpu.memory_space<vmem>>, %arg2: memref<8x32xf32, #tpu.memory_space<vmem>>, %arg3: memref<4x32xf32, #tpu.memory_space<vmem>>, %arg4: memref<8x32xf32, #tpu.memory_space<vmem>>, %arg5: memref<8x32xf32, #tpu.memory_space<vmem>>) attributes {dimension_semantics = [#tpu.dimension_semantics<parallel>], iteration_bounds = array<i64: 2>, scalar_prefetch = 0 : i64, scratch_operands = 0 : i64, tpu.core_type = #tpu.core_type<tc>, window_params = [{transform_indices = @transform_0, window_bounds = array<i64: 8, 32>}, {transform_indices = @transform_1, window_bounds = array<i64: 8, 32>}, {pipeline_mode = #tpu.pipeline_mode<synchronous>, transform_indices = @transform_2, window_bounds = array<i64: 4, 32>}, {transform_indices = @transform_3, window_bounds = array<i64: 8, 32>}, {transform_indices = @transform_4, window_bounds = array<i64: 8, 32>}]} {
    %c0 = arith.constant 0 : index
    %c0_0 = arith.constant 0 : index
    %0 = vector.load %arg3[%c0, %c0_0] : memref<4x32xf32, #tpu.memory_space<vmem>>, vector<4x32xf32>
    %1 = vector.extract_strided_slice %0 {offsets = [0, 0], sizes = [1, 32], strides = [1, 1]} : vector<4x32xf32> to vector<1x32xf32>
    %2 = vector.extract_strided_slice %0 {offsets = [1, 0], sizes = [1, 32], strides = [1, 1]} : vector<4x32xf32> to vector<1x32xf32>
    %3 = vector.extract_strided_slice %0 {offsets = [2, 0], sizes = [1, 32], strides = [1, 1]} : vector<4x32xf32> to vector<1x32xf32>
    %4 = vector.extract_strided_slice %0 {offsets = [3, 0], sizes = [1, 32], strides = [1, 1]} : vector<4x32xf32> to vector<1x32xf32>
    %c0_1 = arith.constant 0 : index
    %c0_2 = arith.constant 0 : index
    %5 = vector.load %arg1[%c0_1, %c0_2] : memref<8x32xf32, #tpu.memory_space<vmem>>, vector<8x32xf32>
    %cst = arith.constant dense<0.000000e+00> : vector<8xf32>
    %6 = vector.multi_reduction <add>, %5, %cst [1] : vector<8x32xf32> to vector<8xf32>
    %7 = vector.shape_cast %6 : vector<8xf32> to vector<8x1xf32>
    %8 = arith.mulf %5, %5 : vector<8x32xf32>
    %cst_3 = arith.constant dense<0.000000e+00> : vector<8xf32>
    %9 = vector.multi_reduction <add>, %8, %cst_3 [1] : vector<8x32xf32> to vector<8xf32>
    %10 = vector.shape_cast %9 : vector<8xf32> to vector<8x1xf32>
    %cst_4 = arith.constant 3.125000e-02 : f32
    %11 = vector.broadcast %cst_4 : f32 to vector<8x1xf32>
    %12 = arith.mulf %7, %11 : vector<8x1xf32>
    %cst_5 = arith.constant 3.125000e-02 : f32
    %13 = vector.broadcast %cst_5 : f32 to vector<8x1xf32>
    %14 = arith.mulf %10, %13 : vector<8x1xf32>
    %15 = arith.mulf %12, %12 : vector<8x1xf32>
    %16 = arith.subf %14, %15 : vector<8x1xf32>
    %cst_6 = arith.constant 0.000000e+00 : f32
    %17 = vector.broadcast %cst_6 : f32 to vector<8x1xf32>
    %18 = arith.maximumf %16, %17 : vector<8x1xf32>
    %19 = vector.broadcast %12 : vector<8x1xf32> to vector<8x32xf32>
    %20 = arith.subf %5, %19 : vector<8x32xf32>
    %cst_7 = arith.constant 9.99999974E-6 : f32
    %21 = vector.broadcast %cst_7 : f32 to vector<8x1xf32>
    %22 = arith.addf %18, %21 : vector<8x1xf32>
    %23 = math.rsqrt %22 : vector<8x1xf32>
    %24 = vector.broadcast %23 : vector<8x1xf32> to vector<8x32xf32>
    %25 = arith.mulf %20, %24 : vector<8x32xf32>
    %26 = vector.broadcast %1 : vector<1x32xf32> to vector<8x32xf32>
    %27 = arith.mulf %26, %25 : vector<8x32xf32>
    %28 = arith.addf %5, %27 : vector<8x32xf32>
    %29 = vector.broadcast %2 : vector<1x32xf32> to vector<8x32xf32>
    %30 = arith.addf %28, %29 : vector<8x32xf32>
    %c0_8 = arith.constant 0 : index
    %c0_9 = arith.constant 0 : index
    %31 = vector.load %arg4[%c0_8, %c0_9] : memref<8x32xf32, #tpu.memory_space<vmem>>, vector<8x32xf32>
    tpu.vector_store %arg4[%c0_8, %c0_9], %30 {strides = array<i32>} : memref<8x32xf32, #tpu.memory_space<vmem>>, vector<8x32xf32>,
    %c0_10 = arith.constant 0 : index
    %c0_11 = arith.constant 0 : index
    %32 = vector.load %arg2[%c0_10, %c0_11] : memref<8x32xf32, #tpu.memory_space<vmem>>, vector<8x32xf32>
    %cst_12 = arith.constant dense<0.000000e+00> : vector<8xf32>
    %33 = vector.multi_reduction <add>, %32, %cst_12 [1] : vector<8x32xf32> to vector<8xf32>
    %34 = vector.shape_cast %33 : vector<8xf32> to vector<8x1xf32>
    %35 = arith.mulf %32, %32 : vector<8x32xf32>
    %cst_13 = arith.constant dense<0.000000e+00> : vector<8xf32>
    %36 = vector.multi_reduction <add>, %35, %cst_13 [1] : vector<8x32xf32> to vector<8xf32>
    %37 = vector.shape_cast %36 : vector<8xf32> to vector<8x1xf32>
    %cst_14 = arith.constant 3.125000e-02 : f32
    %38 = vector.broadcast %cst_14 : f32 to vector<8x1xf32>
    %39 = arith.mulf %34, %38 : vector<8x1xf32>
    %cst_15 = arith.constant 3.125000e-02 : f32
    %40 = vector.broadcast %cst_15 : f32 to vector<8x1xf32>
    %41 = arith.mulf %37, %40 : vector<8x1xf32>
    %42 = arith.mulf %39, %39 : vector<8x1xf32>
    %43 = arith.subf %41, %42 : vector<8x1xf32>
    %cst_16 = arith.constant 0.000000e+00 : f32
    %44 = vector.broadcast %cst_16 : f32 to vector<8x1xf32>
    %45 = arith.maximumf %43, %44 : vector<8x1xf32>
    %46 = vector.broadcast %39 : vector<8x1xf32> to vector<8x32xf32>
    %47 = arith.subf %32, %46 : vector<8x32xf32>
    %cst_17 = arith.constant 9.99999974E-6 : f32
    %48 = vector.broadcast %cst_17 : f32 to vector<8x1xf32>
    %49 = arith.addf %45, %48 : vector<8x1xf32>
    %50 = math.rsqrt %49 : vector<8x1xf32>
    %51 = vector.broadcast %50 : vector<8x1xf32> to vector<8x32xf32>
    %52 = arith.mulf %47, %51 : vector<8x32xf32>
    %53 = vector.broadcast %3 : vector<1x32xf32> to vector<8x32xf32>
    %54 = arith.mulf %53, %52 : vector<8x32xf32>
    %55 = arith.addf %32, %54 : vector<8x32xf32>
    %56 = vector.broadcast %4 : vector<1x32xf32> to vector<8x32xf32>
    %57 = arith.addf %55, %56 : vector<8x32xf32>
    %c0_18 = arith.constant 0 : index
    %c0_19 = arith.constant 0 : index
    %58 = vector.load %arg5[%c0_18, %c0_19] : memref<8x32xf32, #tpu.memory_space<vmem>>, vector<8x32xf32>
    tpu.vector_store %arg5[%c0_18, %c0_19], %57 {strides = array<i32>} : memref<8x32xf32, #tpu.memory_space<vmem>>, vector<8x32xf32>,
    return
  }
  func.func @transform_0(%arg0: i32) -> (i32, i32) {
    %c0_i32 = arith.constant 0 : i32
    %c0_i32_0 = arith.constant 0 : i32
    return %arg0, %c0_i32 : i32, i32
  }
  func.func @transform_1(%arg0: i32) -> (i32, i32) {
    %c0_i32 = arith.constant 0 : i32
    %c0_i32_0 = arith.constant 0 : i32
    return %arg0, %c0_i32 : i32, i32
  }
  func.func @transform_2(%arg0: i32) -> (i32, i32) {
    %c0_i32 = arith.constant 0 : i32
    %c0_i32_0 = arith.constant 0 : i32
    %c0_i32_1 = arith.constant 0 : i32
    return %c0_i32, %c0_i32_0 : i32, i32
  }
  func.func @transform_3(%arg0: i32) -> (i32, i32) {
    %c0_i32 = arith.constant 0 : i32
    %c0_i32_0 = arith.constant 0 : i32
    return %arg0, %c0_i32 : i32, i32
  }
  func.func @transform_4(%arg0: i32) -> (i32, i32) {
    %c0_i32 = arith.constant 0 : i32
    %c0_i32_0 = arith.constant 0 : i32
    return %arg0, %c0_i32 : i32, i32
  }
}

</mosaic_0001>

<bundles_post_ra>
// kernel: tpu_custom_call.1
= control target key start
LH: loop header
LB: loop body
LE: loop exit
PB: predicated region body
PF: predicated region fallthrough
CT: control target
= control target key end

     0   :  { %10 = vsyncpa [#allocation3], 0  ;;  %s1013_s0 = inlined_call_operand.hbm [shape: f32[16,32], index: 0, kind: input, shape index: {}]   ;;  %s1014_s1 = inlined_call_operand.hbm [shape: f32[16,32], index: 1, kind: input, shape index: {}]   ;;  %s1015_s2 = inlined_call_operand.vmem [shape: f32[4,32], index: 2, kind: input, shape index: {}]   ;;  %s1016_s3 = inlined_call_operand.hbm [shape: f32[16,32], index: 3, kind: output, shape index: {0}]   ;;  %s1017_s4 = inlined_call_operand.hbm [shape: f32[16,32], index: 4, kind: output, shape index: {1}]  }
   0x1   :  { %12 = vsyncpa [#allocation3 + $0x1], 0 }
   0x2   :  { %13 = vsyncpa [#allocation6], 0 }
   0x3   :  { %15 = vsyncpa [#allocation6 + $0x1], 0 }
   0x4   :  { %16 = vsyncpa [#allocation4], 0 }
   0x5   :  { %18 = vsyncpa [#allocation4 + $0x1], 0 }
   0x6   :  { %19 = vsyncpa [#allocation9], 0 }
   0x7   :  { %21 = vsyncpa [#allocation9 + $0x1], 0  ;;  %s749_s15 = smov 0   ;;  %s751_s16 = smov 0  }
   0x8   :  { %s753_s17 = smov 0   ;;  %s755_s18 = smov 0  }
   0x9 LB: > { %s770_s19 = sadd.s32 4294967295, %s718_s18   ;;  %s478_s20 = sadd.s32 4294967294, %s718_s18   ;;  %s718_s18 = sphi %s755_s18, %s1036_s18   ;;  %s714_s17 = sphi %s753_s17, %s1035_s17   ;;  %s710_s16 = sphi %s751_s16, %s1034_s16   ;;  %s706_s15 = sphi %s749_s15, %s1033_s15  }
   0xa   : > { %s774_s21 = sadd.s32 1, %s718_s18   ;;  %s34_s22 = sadd.s32 1, %s714_s17 }
   0xb   : > { %s31_s23 = ssub.s32 %s718_s18, %s774_s21  ;;  %p41_p0 = scmp.ne.s32.totalorder %s714_s17, %s710_s16 }
   0xc   : > { %p32_p1 = scmp.eq.s32.totalorder %s31_s23, 0  ;;  %p42_p2 = scmp.eq.s32.totalorder %s718_s18, 0 }
   0xd   : > { %p47_p3 = scmp.ne.s32.totalorder %s710_s16, %s706_s15  ;;  %p48_p4 = scmp.eq.s32.totalorder %s770_s19, 0 }
   0xe   : > { %s786_s24 = scalar_select %p32_p1, %s714_s17, %s34_s22  }
   0xf   : > { %p788_p5 = por %p42_p2, %p41_p0  ;;  %p792_p6 = por %p48_p4, %p47_p3 }
  0x10   : > { %p118_p7 = scmp.eq.s32.totalorder %s770_s19, 1  ;;  %p124_p8 = scmp.eq.s32.totalorder %s478_s20, 1 }
  0x11   : > { %s1021_s26 = scalar_select %p792_p6, 1, 0 }
  0x12   : > { %p518_p10 = scmp.lt.s32.totalorder %s718_s18, 2  ;;  %p799_p11 = por %p118_p7, %p41_p0 }
  0x13   : > { %p803_p12 = por %p124_p8, %p47_p3  ;;  %s808_s29 = sand.u32 1, %s714_s17  }
  0x14   : > { %s1022_s27 = scalar_select %p799_p11, 1, 0 }
  0x15   : > { %s1023_s28 = scalar_select %p803_p12, 1, 0 }
  0x16   : > { %s482_s30 = sshll.u32 %s718_s18, 7  ;;  %s481_s5 = sshll.u32 %s808_s29, 3 }
  0x17   : > { %s817_s8 = scalar_lea.hbm %s1013_s0, %s482_s30  ;;  %s177_s9 = scalar_lea.vmem [#allocation2], %s481_s5 }
  0x18   : > { %s184_s10 = sshll.u32 %s177_s9, 4  ;;  %p823_p13 = pnand %p518_p10, %p788_p5  ;;  %s827_s10 = int_to_ptr.vmem [resolvable:$true] %s184_s10 }
  0x19   : > { %s174_s12 = scalar_lea.sflag [#allocation3], %s808_s29  ;;  %s556_s13 = scalar_lea.hbm %s817_s8, 128 }
  0x1a   : > { %p557_p2 = scmp.ne.s32.totalorder %s817_s8, %s556_s13  ;;  %p558_p3 = pneg %p823_p13 }
  0x1b   : > { %s561_s22 = scalar_lea.hbm %s1013_s0, 256  ;;  %p562_p5 = scmp.lt.u32.totalorder %s817_s8, %s1013_s0 }
  0x1c   : > { %p559_p4 = pnand %p558_p3, %p557_p2  ;;  %p563_p8 = scmp.lt.u32.totalorder %s561_s22, %s556_s13 }
  0x1d   : > { %p565_p9 = scmp.lt.u32.totalorder %s556_s13, %s817_s8 }
  0x1e   : > { %p560_p7 = pneg %p559_p4  ;;  %p564_p10 = por %p563_p8, %p562_p5 }
  0x20   : > { %p566_p0 = por %p565_p9, %p564_p10 }
  0x22   : > { %p567_p1 = pnand %p566_p0, %p560_p7 }
  0x24   : > { %570 = shalt.err (!%p567_p1)
}
  0x25   : > { %s571_s6 = scalar_lea.vmem %s827_s10, 128  ;;  %s720_s7 = smov [#allocation2]  }
  0x26   : > { %p572_p2 = scmp.ne.s32.totalorder %s827_s10, %s571_s6  ;;  %s576_s9 = sshll.u32 %s720_s7, 4  ;;  %s577_s9 = int_to_ptr.vmem [resolvable:$false] %s576_s9 }
  0x27   : > { %s578_s14 = scalar_lea.vmem %s577_s9, 256  ;;  %p579_p11 = scmp.lt.s32.totalorder %s827_s10, %s577_s9 }
  0x28   : > { %p574_p4 = pnand %p572_p2, %p558_p3  ;;  %p580_p5 = scmp.lt.s32.totalorder %s578_s14, %s571_s6 }
  0x2a   : > { %p575_p12 = pneg %p574_p4  ;;  %p581_p8 = por %p580_p5, %p579_p11 }
  0x2c   : > { %p582_p9 = pnand %p581_p8, %p575_p12 }
  0x2e   : > { %585 = shalt.err (!%p582_p9)
}
  0x2f   : > { %507 = dma.hbm_to_vmem [thread:$0]  (!%p823_p13), %s817_s8, 128, %s827_s10, %s174_s12  }
  0x30   : > { %p1025_p0 = scmp.lt.s32.totalorder %s718_s18, 3  ;;  %p1026_p1 = scmp.ge.s32.totalorder %s718_s18, 1 }
  0x31   : > { %s870_s23 = scalar_lea.hbm %s1014_s1, %s482_s30  ;;  %s195_s25 = scalar_lea.vmem [#allocation5], %s481_s5 }
  0x32   : > { %p861_p7 = pnand %p1026_p1, %p1025_p0  ;;  %s202_s6 = sshll.u32 %s195_s25, 4  ;;  %s203_s6 = int_to_ptr.vmem [resolvable:$true] %s202_s6 }
  0x33   : > { %s192_s8 = scalar_lea.sflag [#allocation6], %s808_s29  ;;  %s586_s10 = scalar_lea.hbm %s870_s23, 128 }
  0x34   : > { %s1027_s13 = scalar_select %p861_p7, 1, 0 }
  0x35   : > { %p587_p11 = scmp.ne.s32.totalorder %s870_s23, %s586_s10  ;;  %s591_s30 = scalar_lea.hbm %s1014_s1, 256 }
  0x36   : > { %p592_p2 = scmp.lt.u32.totalorder %s870_s23, %s1014_s1  ;;  %p593_p4 = scmp.lt.u32.totalorder %s591_s30, %s586_s10 }
  0x37   : > { %p589_p12 = pnand %p587_p11, %p558_p3  ;;  %p595_p8 = scmp.lt.u32.totalorder %s586_s10, %s870_s23 }
  0x38   : > { %p594_p5 = por %p593_p4, %p592_p2 }
  0x39   : > { %p590_p10 = pneg %p589_p12 }
  0x3a   : > { %p596_p9 = por %p595_p8, %p594_p5 }
  0x3c   : > { %p597_p0 = pnand %p596_p9, %p590_p10 }
  0x3e   : > { %600 = shalt.err (!%p597_p0)
}
  0x3f   : > { %s601_s29 = scalar_lea.vmem %s203_s6, 128  ;;  %s721_s5 = smov [#allocation5]  }
  0x40   : > { %p602_p1 = scmp.ne.s32.totalorder %s203_s6, %s601_s29  ;;  %s606_s20 = sshll.u32 %s721_s5, 4  ;;  %s607_s20 = int_to_ptr.vmem [resolvable:$false] %s606_s20 }
  0x41   : > { %s608_s22 = scalar_lea.vmem %s607_s20, 256  ;;  %p609_p6 = scmp.lt.s32.totalorder %s203_s6, %s607_s20 }
  0x42   : > { %p604_p11 = pnand %p602_p1, %p558_p3  ;;  %p610_p7 = scmp.lt.s32.totalorder %s608_s22, %s601_s29 }
  0x44   : > { %p605_p12 = pneg %p604_p11  ;;  %p611_p2 = por %p610_p7, %p609_p6 }
  0x46   : > { %p612_p4 = pnand %p611_p2, %p605_p12 }
  0x48   : > { %615 = shalt.err (!%p612_p4)
}
  0x49   : > { %510 = dma.hbm_to_vmem [thread:$0]  (!%p823_p13), %s870_s23, 128, %s203_s6, %s192_s8  }
  0x4a   : > { %p1028_p10 = scmp.ne.s32.totalorder %s1027_s13, 0 }
  0x4b   : > { %s897_s25 = sand.u32 (!%p1028_p10), 1, %s710_s16   ;;  %p1029_p6 = scmp.ne.s32.totalorder (!%p1028_p10), %s1021_s26, 0 }
  0x4c   : > { %211 = sbr.rel (%p1028_p10) target bundleno = 296 (0x128), region = 32  ;;  %s900_s10 = sshll.u32 (!%p1028_p10), %s897_s25, 3 }
  0x4d   : > { %s214_s12 = scalar_lea.sflag (!%p1028_p10), [#allocation3], %s897_s25  ;;  %s217_s7 = scalar_lea.vmem (!%p1028_p10), [#allocation2], %s900_s10 }
  0x53   : > { %689 = dma.done.wait (%p1029_p6), %s214_s12, 128  }
  0x54   : > { %691 = vsyncadd (%p1029_p6), %s214_s12, 4294967168  ;;  %s223_s11 = scalar_lea.sflag [#allocation6], %s897_s25  ;;  %s226_s13 = scalar_lea.vmem [#allocation5], %s900_s10 }
  0x55   : > { %693 = dma.done.wait (%p1029_p6), %s223_s11, 128  }
  0x56   : > { %695 = vsyncadd (%p1029_p6), %s223_s11, 4294967168  ;;  %vm263_vm0 = vcmask 261120   ;;  %v262_v0 = vld [vmem:[%s217_s7] sm:$0xff]  ;;  %v292_v1 = vld [vmem:[%s226_s13] sm:$0xff]  ;;  %v280_v20 = vlaneseq  ;;  %s492_s6 = sshll.u32 %s770_s19, 7  ;;  %s253_s8 = scalar_lea.vmem [#allocation7], %s900_s10 }
  0x57   : > { %v264_v2 = vsel %vm263_vm0, %v262_v0, 0.0  ;;  %v267_v3 = vmul.f32 %v262_v0, %v262_v0  ;;  %v296_v4 = vmul.f32 %v292_v1, %v292_v1  ;;  %v293_v6 = vsel %vm263_vm0, %v292_v1, 0.0  ;;  %v261_v27 = vld [vmem:[%s1015_s2] sm:$0xf]  ;;  %s340_s30 = sshll.u32 %s253_s8, 4  ;;  %s928_s29 = scalar_lea.hbm %s1016_s3, %s492_s6  ;;  %s930_s30 = int_to_ptr.vmem [resolvable:$true] %s340_s30 }
  0x58   : > { %265 = vadd.xlane.f32.xlu0 %v264_v2  ;;  %v281_v24 = vshrl.u32 %v280_v20, 7  ;;  %s260_s5 = scalar_lea.vmem [#allocation8], %s900_s10  ;;  %s322_s22 = scalar_lea.sflag [#allocation4], %s897_s25 }
  0x59   : > { %v268_v5 = vsel %vm263_vm0, %v267_v3, 0.0  ;;  %v297_v7 = vsel %vm263_vm0, %v296_v4, 0.0  ;;  %s935_s20 = sshll.u32 %s260_s5, 4  ;;  %s616_s12 = scalar_lea.vmem %s930_s30, 128  ;;  %s968_s20 = int_to_ptr.vmem [resolvable:$true] %s935_s20 }
  0x5a   : > { %269 = vadd.xlane.f32.xlu1 %v268_v5  ;;  %v282_v26 = vsub.s32 0, %v281_v24  ;;  %v311_v28 = vsub.s32 2, %v281_v24  ;;  %v288_v31 = vsub.s32 1, %v281_v24  ;;  %v317_v38 = vsub.s32 3, %v281_v24  ;;  %p617_p13 = scmp.ne.s32.totalorder %s930_s30, %s616_s12  ;;  %p1030_p3 = scmp.ne.s32.totalorder %s1022_s27, 0 }
  0x5b   : > { %s722_s7 = smov [#allocation7]  }
  0x5c   : > { %294 = vadd.xlane.f32.xlu0 %v293_v6  ;;  %v283_v30 = vrot.slane %v261_v27, %v282_v26  ;;  %v312_v34 = vrot.slane %v261_v27, %v311_v28  ;;  %v289_v37 = vrot.slane %v261_v27, %v288_v31  ;;  %v318_v44 = vrot.slane %v261_v27, %v317_v38  ;;  %p618_p7 = pnand %p617_p13, %p1030_p3  ;;  %s620_s11 = sshll.u32 %s722_s7, 4  ;;  %s621_s11 = int_to_ptr.vmem [resolvable:$false] %s620_s11 }
  0x5d   : > { %s622_s13 = scalar_lea.vmem %s621_s11, 256  ;;  %p623_p8 = scmp.lt.s32.totalorder %s930_s30, %s621_s11 }
  0x5e   : > { %298 = vadd.xlane.f32.xlu1 %v297_v7  ;;  %p619_p5 = pneg %p618_p7  ;;  %p624_p9 = scmp.lt.s32.totalorder %s622_s13, %s616_s12 }
  0x60   : > { %p625_p0 = por %p624_p9, %p623_p8 }
  0x62   : > { %p626_p1 = pnand %p625_p0, %p619_p5 }
  0xe5   : > { %v266_v8 = vpop.xlane.xlu0 %265 }
  0xe6   : > { %v271_v9 = vmul.f32 0.03125, %v266_v8 }
  0xe7   : > { %v270_v10 = vpop.xlane.xlu1 %269 }
  0xe8   : > { %v273_v11 = vmul.f32 %v271_v9, %v271_v9  ;;  %v272_v12 = vmul.f32 0.03125, %v270_v10  ;;  %v276_v29 = vsub.f32 %v262_v0, %v271_v9 }
  0xe9   : > { %v295_v13 = vpop.xlane.xlu0 %294 }
  0xea   : > { %v274_v14 = vsub.f32 %v272_v12, %v273_v11  ;;  %v300_v15 = vmul.f32 0.03125, %v295_v13 }
  0xeb   : > { %v299_v16 = vpop.xlane.xlu1 %298 }
  0xec   : > { %v275_v17 = vmax.f32 %v274_v14, 0.0  ;;  %v302_v18 = vmul.f32 %v300_v15, %v300_v15  ;;  %v301_v19 = vmul.f32 0.03125, %v299_v16  ;;  %v305_v36 = vsub.f32 %v292_v1, %v300_v15 }
  0xee   : > { %v277_v21 = vadd.f32 1e-05, %v275_v17  ;;  %v303_v22 = vsub.f32 %v301_v19, %v302_v18 }
  0xf0   : > { %552 = vrsqrt.f32 %v277_v21  ;;  %v304_v23 = vmax.f32 %v303_v22, 0.0 }
  0xf2   : > { %v306_v25 = vadd.f32 1e-05, %v304_v23 }
  0xf4   : > { %554 = vrsqrt.f32 %v306_v25 }
  0xfa   : > { %v553_v32 = vpop.eup %552 }
  0xfb   : > { %v279_v33 = vmul.f32 %v553_v32, %v276_v29 }
  0xfd   : > { %v284_v35 = vmul.f32 %v283_v30, %v279_v33 }
  0xfe   : > { %v555_v39 = vpop.eup %554 }
  0xff   : > { %v308_v40 = vmul.f32 %v555_v39, %v305_v36  ;;  %v285_v41 = vadd.f32 %v284_v35, %v262_v0 }
 0x101   : > { %v313_v42 = vmul.f32 %v312_v34, %v308_v40  ;;  %v290_v43 = vadd.f32 %v289_v37, %v285_v41 }
 0x103   : > { %291 = vst.msk [vmem:[%s253_s8] sm:$0xff] %vm263_vm0, %v290_v43  ;;  %v314_v45 = vadd.f32 %v313_v42, %v292_v1 }
 0x104   : > { %629 = shalt.err (!%p626_p1)
}
 0x105   : > { %s630_s26 = scalar_lea.hbm %s928_s29, 128  ;;  %s634_s9 = scalar_lea.hbm %s1016_s3, 256 }
 0x106   : > { %p631_p11 = scmp.ne.s32.totalorder %s928_s29, %s630_s26  ;;  %p635_p4 = scmp.lt.u32.totalorder %s928_s29, %s1016_s3 }
 0x107   : > { %p636_p10 = scmp.lt.u32.totalorder %s634_s9, %s630_s26  ;;  %p638_p13 = scmp.lt.u32.totalorder %s630_s26, %s928_s29 }
 0x108   : > { %p632_p12 = pnand %p631_p11, %p1030_p3 }
 0x109   : > { %p637_p6 = por %p636_p10, %p635_p4 }
 0x10a   : > { %p633_p2 = pneg %p632_p12 }
 0x10b   : > { %p639_p7 = por %p638_p13, %p637_p6 }
 0x10d   : > { %p640_p5 = pnand %p639_p7, %p633_p2 }
 0x10f   : > { %643 = shalt.err (!%p640_p5)
}
 0x110   : > { %500 = dma.vmem_to_hbm [thread:$0]  (%p1030_p3), %s930_s30, 128, %s928_s29, %s322_s22   ;;  %v319_v46 = vadd.f32 %v318_v44, %v314_v45 }
 0x111   : > { %s965_s13 = scalar_lea.hbm %s1017_s4, %s492_s6  ;;  %s327_s26 = scalar_lea.sflag [#allocation9], %s897_s25 }
 0x112   : > { %320 = vst.msk [vmem:[%s260_s5] sm:$0xff] %vm263_vm0, %v319_v46  ;;  %s644_s23 = scalar_lea.vmem %s968_s20, 128  ;;  %s723_s19 = smov [#allocation8]  }
 0x113   : > { %p645_p8 = scmp.ne.s32.totalorder %s968_s20, %s644_s23  ;;  %s648_s30 = sshll.u32 %s723_s19, 4  ;;  %s649_s30 = int_to_ptr.vmem [resolvable:$false] %s648_s30 }
 0x114   : > { %s650_s29 = scalar_lea.vmem %s649_s30, 256  ;;  %p651_p1 = scmp.lt.s32.totalorder %s968_s20, %s649_s30 }
 0x115   : > { %p646_p9 = pnand %p645_p8, %p1030_p3  ;;  %p652_p11 = scmp.lt.s32.totalorder %s650_s29, %s644_s23 }
 0x117   : > { %p647_p0 = pneg %p646_p9  ;;  %p653_p12 = por %p652_p11, %p651_p1 }
 0x119   : > { %p654_p2 = pnand %p653_p12, %p647_p0 }
 0x11b   : > { %657 = shalt.err (!%p654_p2)
}
 0x11c   : > { %s658_s25 = scalar_lea.hbm %s965_s13, 128  ;;  %s662_s5 = scalar_lea.hbm %s1017_s4, 256 }
 0x11d   : > { %p659_p4 = scmp.ne.s32.totalorder %s965_s13, %s658_s25  ;;  %p663_p13 = scmp.lt.u32.totalorder %s965_s13, %s1017_s4 }
 0x11e   : > { %p664_p7 = scmp.lt.u32.totalorder %s662_s5, %s658_s25  ;;  %p666_p8 = scmp.lt.u32.totalorder %s658_s25, %s965_s13 }
 0x11f   : > { %p660_p10 = pnand %p659_p4, %p1030_p3 }
 0x120   : > { %p665_p5 = por %p664_p7, %p663_p13 }
 0x121   : > { %p661_p6 = pneg %p660_p10 }
 0x122   : > { %p667_p9 = por %p666_p8, %p665_p5 }
 0x124   : > { %p668_p0 = pnand %p667_p9, %p661_p6 }
 0x126   : > { %671 = shalt.err (!%p668_p0)
}
 0x127   : > { %501 = dma.vmem_to_hbm [thread:$0]  (%p1030_p3), %s968_s20, 128, %s965_s13, %s327_s26  }
 0x128 PF: > { %s365_s9 = sand.u32 1, %s706_s15   ;;  %p1031_p1 = scmp.ne.s32.totalorder %s1023_s28, 0 }
 0x129   : > { %p1032_p11 = scmp.ge.s32.totalorder %s718_s18, 2  ;;  %s366_s14 = scalar_lea.sflag [#allocation4], %s365_s9 }
 0x12b   : > { %p512_p12 = pnand %p1032_p11, %p1031_p1 }
 0x12d   : > { %697 = dma.done.wait (!%p512_p12), %s366_s14, 128  }
 0x12e   : > { %699 = vsyncadd (!%p512_p12), %s366_s14, 4294967168  ;;  %s375_s7 = scalar_lea.sflag [#allocation9], %s365_s9 }
 0x12f   : > { %701 = dma.done.wait (!%p512_p12), %s375_s7, 128  }
 0x130   : > { %703 = vsyncadd (!%p512_p12), %s375_s7, 4294967168  ;;  %p24_p3 = scmp.ge.s32.totalorder %s774_s21, 4   ;;  %s1033_s15 = smov %s710_s16 }
 0x131   : > { %s1034_s16 = smov %s714_s17  ;;  %s1035_s17 = smov %s786_s24 }
 0x132   : > { %s1036_s18 = smov %s774_s21  ;;  %26 = sbr.rel (!%p24_p3) target bundleno = 9 (0x9), region = 107 }
 0x139   :  { %380 = vsyncpa [#allocation3], 1 }
 0x13a   :  { %382 = vsyncpa [#allocation3 + $0x1], 1 }
 0x13b   :  { %383 = vsyncpa [#allocation6], 1 }
 0x13c   :  { %385 = vsyncpa [#allocation6 + $0x1], 1 }
 0x13d   :  { %386 = vsyncpa [#allocation4], 1 }
 0x13e   :  { %388 = vsyncpa [#allocation4 + $0x1], 1 }
 0x13f   :  { %389 = vsyncpa [#allocation9], 1 }
 0x140   :  { %391 = vsyncpa [#allocation9 + $0x1], 1 }

</bundles_post_ra>
